<compile_context>
chip_gen: v7x
topology: tpu7x:2x2x1
jax: 0.10.0
libtpu: 0.0.40
codegen_flags: <defaults>
</compile_context>

<pallas_src>
import math
import functools

import numpy as np
import jax
import jax.numpy as jnp
from jax.experimental import pallas as pl
from jax.experimental.pallas import tpu as pltpu


def _round_up(x, m):
    return ((x + m - 1) // m) * m


# ----------------------------- in-kernel math -----------------------------
def _erf_poly(x):
    """Abramowitz & Stegun 7.1.26 erf approximation (|err| < 1.5e-7).

    Uses only mul/add/div/abs/where + one EUP exp, so it lowers cleanly on
    Mosaic and reproduces nn.GELU()'s exact (erf-based) activation.
    """
    a1, a2, a3, a4, a5 = (0.254829592, -0.284496736, 1.421413741,
                          -1.453152027, 1.061405429)
    p = 0.3275911
    sgn = jnp.where(x >= 0.0, 1.0, -1.0)
    ax = jnp.abs(x)
    t = 1.0 / (1.0 + p * ax)
    poly = ((((a5 * t + a4) * t + a3) * t + a2) * t + a1) * t
    return sgn * (1.0 - poly * jnp.exp(-ax * ax))


def _gelu_exact(x):
    # nn.GELU(): 0.5 * x * (1 + erf(x / sqrt(2)))
    return 0.5 * x * (1.0 + _erf_poly(x * (1.0 / math.sqrt(2.0))))


# Contract the last axis of both operands (A @ B^T) -- lets us keep the torch
# (out, in) weight layouts with no host-side transpose.
_NT = (((1,), (1,)), ((), ()))


def _lm_head_kernel(x_ref, wd_ref, bd_ref, g_ref, b_ref, wv_ref, bv_ref,
                    out_ref, t_ref, *, eps):
    # ---- Stage 1: prediction-head transform, once per row tile -------------
    # NOTE: this scratch-cache pattern is only correct while the vocab axis is
    # the innermost, sequentially swept ("arbitrary") grid axis.  Do not
    # reorder the grid or mark axis 1 as "parallel".
    @pl.when(pl.program_id(1) == 0)
    def _():
        x = x_ref[...]
        # x @ W_dense^T with f32 accumulation (torch (E, H) layout kept).
        h = jax.lax.dot_general(x, wd_ref[...], _NT,
                                preferred_element_type=jnp.float32)
        h = h + bd_ref[...]
        h = _gelu_exact(h)
        mean = jnp.mean(h, axis=-1, keepdims=True)
        var = jnp.mean(jnp.square(h - mean), axis=-1, keepdims=True)
        ln = (h - mean) * jax.lax.rsqrt(var + eps) * g_ref[...] + b_ref[...]
        # Cache directly in the matmul dtype: half the scratch, and no
        # per-vocab-tile cast in stage 2.
        t_ref[...] = ln.astype(t_ref.dtype)

    # ---- Stage 2: decoder logits for this (row tile, vocab tile) -----------
    logits = jax.lax.dot_general(t_ref[...], wv_ref[...], _NT,
                                 preferred_element_type=jnp.float32)
    out_ref[...] = (logits + bv_ref[...]).astype(out_ref.dtype)


# --------------------------------- wrapper ---------------------------------
def roformer_lm_prediction_head(hidden, w_dense, b_dense, gamma, beta,
                                w_decoder, decoder_bias, *, eps=1e-12,
                                block_rows=None, block_vocab=None,
                                matmul_dtype=jnp.bfloat16, out_dtype=None):
    """Fused RoFormerLMPredictionHead forward.

    hidden:       (B, S, H)
    w_dense:      (E, H)  torch nn.Linear layout (out, in)
    b_dense:      (E,)
    gamma, beta:  (E,)    LayerNorm weight / bias
    w_decoder:    (V, E)  torch nn.Linear layout (out, in)
    decoder_bias: (V,)
    Returns (B, S, V) logits in `out_dtype` (default: hidden.dtype).
    """
    B, S, H = hidden.shape
    E = w_dense.shape[0]
    V = w_decoder.shape[0]
    N = B * S
    out_dtype = hidden.dtype if out_dtype is None else out_dtype

    # ---- tile selection -----------------------------------------------------
    if block_rows is None:
        if N <= 16:
            block_rows = _round_up(N, 8)
        else:
            # Big row tiles cut W_dec re-streaming (arithmetic intensity of the
            # decoder matmul ~ block_rows flop/byte); keep >= 2 row tiles so
            # the "parallel" row axis shards across both v7x TensorCores.
            block_rows = min(512, _round_up(-(-N // 2), 8))
    block_rows = _round_up(int(block_rows), 8)
    if block_vocab is None:
        # 2048-wide bf16 decoder tiles double-buffer comfortably inside v7x's
        # 64 MiB VMEM (and v5e / v6e's 128 MiB).
        block_vocab = min(_round_up(V, 128), 2048)
    block_vocab = _round_up(int(block_vocab), 128)

    N_pad = _round_up(N, block_rows)
    V_pad = _round_up(V, block_vocab)

    # ---- operand prep (torch layouts kept; no host-side transposes) --------
    x = hidden.reshape(N, H)
    if N_pad != N:
        x = jnp.pad(x, ((0, N_pad - N), (0, 0)))
    x = x.astype(matmul_dtype)

    wd = jnp.asarray(w_dense).astype(matmul_dtype)            # (E, H)
    wv = jnp.asarray(w_decoder)                               # (V, E)
    bv = jnp.asarray(decoder_bias)
    if V_pad != V:
        wv = jnp.pad(wv, ((0, V_pad - V), (0, 0)))
        bv = jnp.pad(bv, (0, V_pad - V))
    wv = wv.astype(matmul_dtype)
    bd = jnp.asarray(b_dense).reshape(1, E).astype(jnp.float32)
    g = jnp.asarray(gamma).reshape(1, E).astype(jnp.float32)
    b = jnp.asarray(beta).reshape(1, E).astype(jnp.float32)
    bv = bv.reshape(1, V_pad).astype(jnp.float32)

    grid = (N_pad // block_rows, V_pad // block_vocab)
    kernel = functools.partial(_lm_head_kernel, eps=eps)

    # ---- VMEM budget / scheduler hints --------------------------------------
    msize = jnp.dtype(matmul_dtype).itemsize
    osize = jnp.dtype(out_dtype).itemsize
    vmem_est = (2 * block_rows * H * msize                 # x tiles (2 bufs)
                + 2 * E * H * msize                        # W_dense (const map)
                + 2 * block_vocab * E * msize              # W_dec tiles
                + 2 * block_rows * block_vocab * osize     # out tiles
                + block_rows * E * msize                   # cached transform
                + 8 * (3 * E + 2 * V_pad))                 # small f32 vectors
    vmem_limit = int(min(64 * 1024 * 1024,
                         max(32 * 1024 * 1024, round(vmem_est * 1.5))))
    n_row_tiles = N_pad // block_rows
    cost = pl.CostEstimate(
        flops=2 * N_pad * H * E + 2 * N_pad * E * V_pad,
        transcendentals=N_pad * E,                         # one exp per GELU elem
        bytes_accessed=(N_pad * H * msize + E * H * msize
                        + n_row_tiles * V_pad * E * msize  # W_dec re-streamed
                        + N_pad * V_pad * osize + 4 * (3 * E + V_pad)))

    # TODO(synk): on a VMEM-pressed v7x config, W_dense could additionally be
    # single-buffered (pipeline_mode=pl.Buffered(1)) to reclaim its second
    # buffer; with bf16 + the default tiles the budget above fits without it.
    grid_spec = pltpu.PrefetchScalarGridSpec(
        num_scalar_prefetch=0,
        grid=grid,
        in_specs=[
            pl.BlockSpec((block_rows, H), lambda i, j: (i, 0)),      # x rows
            pl.BlockSpec((E, H), lambda i, j: (0, 0)),               # W_dense
            pl.BlockSpec((1, E), lambda i, j: (0, 0)),               # b_dense
            pl.BlockSpec((1, E), lambda i, j: (0, 0)),               # LN gamma
            pl.BlockSpec((1, E), lambda i, j: (0, 0)),               # LN beta
            pl.BlockSpec((block_vocab, E), lambda i, j: (j, 0)),     # W_dec tile
            pl.BlockSpec((1, block_vocab), lambda i, j: (0, j)),     # dec bias
        ],
        out_specs=pl.BlockSpec((block_rows, block_vocab), lambda i, j: (i, j)),
        scratch_shapes=[pltpu.VMEM((block_rows, E), matmul_dtype)],  # cached LN
    )

    out = pl.pallas_call(
        kernel,
        out_shape=jax.ShapeDtypeStruct((N_pad, V_pad), out_dtype),
        grid_spec=grid_spec,
        compiler_params=pltpu.CompilerParams(
            dimension_semantics=("parallel", "arbitrary"),
            vmem_limit_bytes=vmem_limit),
        cost_estimate=cost,
    )(x, wd, bd, g, b, wv, bv)

    out = out[:N, :V]
    return out.reshape(B, S, V)


# ---------------------------- pure-JAX reference ----------------------------
def reference_forward(hidden, w_dense, b_dense, gamma, beta,
                      w_decoder, decoder_bias, *, eps=1e-12):
    h = hidden @ w_dense.T + b_dense
    h = jax.nn.gelu(h, approximate=False)            # exact (erf) GELU = nn.GELU()
    mean = jnp.mean(h, axis=-1, keepdims=True)
    var = jnp.mean(jnp.square(h - mean), axis=-1, keepdims=True)
    h = (h - mean) / jnp.sqrt(var + eps) * gamma + beta
    return h @ w_decoder.T + decoder_bias


if __name__ == "__main__":
    eps = 1e-12
    key = jax.random.PRNGKey(0)
    ks = jax.random.split(key, 7)

    # Small config consistent with the module: B=2, S=8, hidden=32,
    # embedding=32, vocab=256.
    B, S, H, E, V = 2, 8, 32, 32, 256
    hidden = jax.random.normal(ks[0], (B, S, H), jnp.float32)
    w_dense = 0.1 * jax.random.normal(ks[1], (E, H), jnp.float32)     # (out, in)
    b_dense = 0.1 * jax.random.normal(ks[2], (E,), jnp.float32)
    gamma = 1.0 + 0.1 * jax.random.normal(ks[3], (E,), jnp.float32)
    beta = 0.1 * jax.random.normal(ks[4], (E,), jnp.float32)
    w_decoder = 0.1 * jax.random.normal(ks[5], (V, E), jnp.float32)   # (out, in)
    decoder_bias = 0.1 * jax.random.normal(ks[6], (V,), jnp.float32)

    ref = reference_forward(hidden, w_dense, b_dense, gamma, beta,
                            w_decoder, decoder_bias, eps=eps)

    # 1) Default fast path: bf16 matmul operands, f32 accumulation / LN math.
    #    Tiles chosen to exercise both grid axes (grid = (2, 2)).
    out_bf16 = roformer_lm_prediction_head(
        hidden, w_dense, b_dense, gamma, beta, w_decoder, decoder_bias,
        eps=eps, block_rows=8, block_vocab=128)
    out_bf16 = jax.block_until_ready(out_bf16)
    np.testing.assert_allclose(np.asarray(out_bf16, np.float32),
                               np.asarray(ref), atol=5e-2, rtol=5e-2)

    # 2) f32 path: tight match against the reference.
    out_f32 = roformer_lm_prediction_head(
        hidden, w_dense, b_dense, gamma, beta, w_decoder, decoder_bias,
        eps=eps, block_rows=8, block_vocab=128, matmul_dtype=jnp.float32)
    out_f32 = jax.block_until_ready(out_f32)
    np.testing.assert_allclose(np.asarray(out_f32), np.asarray(ref),
                               atol=1e-4, rtol=1e-4)

    # 3) Ragged shapes (rows and vocab not tile multiples) -> padding path.
    B2, S2, V2 = 2, 7, 200
    hidden2 = jax.random.normal(ks[0], (B2, S2, H), jnp.float32)
    w_decoder2 = 0.1 * jax.random.normal(ks[5], (V2, E), jnp.float32)
    decoder_bias2 = 0.1 * jax.random.normal(ks[6], (V2,), jnp.float32)
    ref2 = reference_forward(hidden2, w_dense, b_dense, gamma, beta,
                             w_decoder2, decoder_bias2, eps=eps)
    out2 = roformer_lm_prediction_head(
        hidden2, w_dense, b_dense, gamma, beta, w_decoder2, decoder_bias2,
        eps=eps)
    out2 = jax.block_until_ready(out2)
    np.testing.assert_allclose(np.asarray(out2, np.float32),
                               np.asarray(ref2), atol=5e-2, rtol=5e-2)

    print("KERNEL_OK")
</pallas_src>

<mosaic_0001>
module attributes {stable_mosaic.version = 11 : i64} {
  func.func @_lm_head_kernel(%arg0: i32, %arg1: i32, %arg2: memref<8x32xbf16, #tpu.memory_space<vmem>>, %arg3: memref<32x32xbf16, #tpu.memory_space<vmem>>, %arg4: memref<1x32xf32, #tpu.memory_space<vmem>>, %arg5: memref<1x32xf32, #tpu.memory_space<vmem>>, %arg6: memref<1x32xf32, #tpu.memory_space<vmem>>, %arg7: memref<128x32xbf16, #tpu.memory_space<vmem>>, %arg8: memref<1x128xf32, #tpu.memory_space<vmem>>, %arg9: memref<8x128xf32, #tpu.memory_space<vmem>>, %arg10: memref<8x32xbf16, #tpu.memory_space<vmem>>) attributes {dimension_semantics = [#tpu.dimension_semantics<parallel>, #tpu.dimension_semantics<arbitrary>], iteration_bounds = array<i64: 2, 2>, scalar_prefetch = 0 : i64, scratch_operands = 1 : i64, tpu.core_type = #tpu.core_type<tc>, window_params = [{transform_indices = @transform_0, window_bounds = array<i64: 8, 32>}, {pipeline_mode = #tpu.pipeline_mode<synchronous>, transform_indices = @transform_1, window_bounds = array<i64: 32, 32>}, {pipeline_mode = #tpu.pipeline_mode<synchronous>, transform_indices = @transform_2, window_bounds = array<i64: 1, 32>}, {pipeline_mode = #tpu.pipeline_mode<synchronous>, transform_indices = @transform_3, window_bounds = array<i64: 1, 32>}, {pipeline_mode = #tpu.pipeline_mode<synchronous>, transform_indices = @transform_4, window_bounds = array<i64: 1, 32>}, {transform_indices = @transform_5, window_bounds = array<i64: 128, 32>}, {transform_indices = @transform_6, window_bounds = array<i64: 1, 128>}, {transform_indices = @transform_7, window_bounds = array<i64: 8, 128>}]} {
    %c0_i32 = arith.constant 0 : i32
    %0 = arith.cmpi eq, %arg1, %c0_i32 : i32
    %1 = arith.extui %0 : i1 to i32
    %c0_i32_0 = arith.constant 0 : i32
    %2 = arith.cmpi ne, %1, %c0_i32_0 : i32
    scf.if %2 {
      %c0_8 = arith.constant 0 : index
      %c0_9 = arith.constant 0 : index
      %10 = vector.load %arg2[%c0_8, %c0_9] : memref<8x32xbf16, #tpu.memory_space<vmem>>, vector<8x32xbf16>
      %c0_10 = arith.constant 0 : index
      %c0_11 = arith.constant 0 : index
      %11 = vector.load %arg3[%c0_10, %c0_11] : memref<32x32xbf16, #tpu.memory_space<vmem>>, vector<32x32xbf16>
      %cst_12 = arith.constant dense<0.000000e+00> : vector<8x32xf32>
      %12 = tpu.matmul %10, %11, %cst_12 {dimension_numbers = #tpu.dot_dimension_numbers<[1], [1], [0], [0], [0, 0, 1, 0], [], []>} : vector<8x32xbf16>, vector<32x32xbf16>, vector<8x32xf32> -> vector<8x32xf32>
      %c0_13 = arith.constant 0 : index
      %c0_14 = arith.constant 0 : index
      %13 = vector.load %arg4[%c0_13, %c0_14] : memref<1x32xf32, #tpu.memory_space<vmem>>, vector<1x32xf32>
      %14 = vector.broadcast %13 : vector<1x32xf32> to vector<8x32xf32>
      %15 = arith.addf %12, %14 : vector<8x32xf32>
      %cst_15 = arith.constant 5.000000e-01 : f32
      %16 = vector.broadcast %cst_15 : f32 to vector<8x32xf32>
      %17 = arith.mulf %16, %15 : vector<8x32xf32>
      %cst_16 = arith.constant 0.707106769 : f32
      %18 = vector.broadcast %cst_16 : f32 to vector<8x32xf32>
      %19 = arith.mulf %15, %18 : vector<8x32xf32>
      %cst_17 = arith.constant 0.000000e+00 : f32
      %20 = vector.broadcast %cst_17 : f32 to vector<8x32xf32>
      %21 = arith.cmpf oge, %19, %20 : vector<8x32xf32>
      %cst_18 = arith.constant 1.000000e+00 : f32
      %cst_19 = arith.constant -1.000000e+00 : f32
      %22 = vector.broadcast %cst_18 : f32 to vector<8x32xf32>
      %23 = vector.broadcast %cst_19 : f32 to vector<8x32xf32>
      %24 = arith.select %21, %22, %23 : vector<8x32xi1>, vector<8x32xf32>
      %25 = math.absf %19 : vector<8x32xf32>
      %cst_20 = arith.constant 0.327591091 : f32
      %26 = vector.broadcast %cst_20 : f32 to vector<8x32xf32>
      %27 = arith.mulf %26, %25 : vector<8x32xf32>
      %cst_21 = arith.constant 1.000000e+00 : f32
      %28 = vector.broadcast %cst_21 : f32 to vector<8x32xf32>
      %29 = arith.addf %28, %27 : vector<8x32xf32>
      %cst_22 = arith.constant 1.000000e+00 : f32
      %30 = vector.broadcast %cst_22 : f32 to vector<8x32xf32>
      %31 = arith.divf %30, %29 : vector<8x32xf32>
      %cst_23 = arith.constant 1.06140542 : f32
      %32 = vector.broadcast %cst_23 : f32 to vector<8x32xf32>
      %33 = arith.mulf %32, %31 : vector<8x32xf32>
      %cst_24 = arith.constant -1.45315206 : f32
      %34 = vector.broadcast %cst_24 : f32 to vector<8x32xf32>
      %35 = arith.addf %33, %34 : vector<8x32xf32>
      %36 = arith.mulf %35, %31 : vector<8x32xf32>
      %cst_25 = arith.constant 1.42141378 : f32
      %37 = vector.broadcast %cst_25 : f32 to vector<8x32xf32>
      %38 = arith.addf %36, %37 : vector<8x32xf32>
      %39 = arith.mulf %38, %31 : vector<8x32xf32>
      %cst_26 = arith.constant -0.284496725 : f32
      %40 = vector.broadcast %cst_26 : f32 to vector<8x32xf32>
      %41 = arith.addf %39, %40 : vector<8x32xf32>
      %42 = arith.mulf %41, %31 : vector<8x32xf32>
      %cst_27 = arith.constant 0.254829586 : f32
      %43 = vector.broadcast %cst_27 : f32 to vector<8x32xf32>
      %44 = arith.addf %42, %43 : vector<8x32xf32>
      %45 = arith.mulf %44, %31 : vector<8x32xf32>
      %cst_28 = arith.constant 0.000000e+00 : f32
      %46 = vector.broadcast %cst_28 : f32 to vector<8x32xf32>
      %47 = arith.subf %46, %25 : vector<8x32xf32>
      %48 = arith.mulf %47, %25 : vector<8x32xf32>
      %49 = math.exp %48 : vector<8x32xf32>
      %50 = arith.mulf %45, %49 : vector<8x32xf32>
      %cst_29 = arith.constant 1.000000e+00 : f32
      %51 = vector.broadcast %cst_29 : f32 to vector<8x32xf32>
      %52 = arith.subf %51, %50 : vector<8x32xf32>
      %53 = arith.mulf %24, %52 : vector<8x32xf32>
      %cst_30 = arith.constant 1.000000e+00 : f32
      %54 = vector.broadcast %cst_30 : f32 to vector<8x32xf32>
      %55 = arith.addf %54, %53 : vector<8x32xf32>
      %56 = arith.mulf %17, %55 : vector<8x32xf32>
      %cst_31 = arith.constant dense<0.000000e+00> : vector<8xf32>
      %57 = vector.multi_reduction <add>, %56, %cst_31 [1] : vector<8x32xf32> to vector<8xf32>
      %58 = vector.shape_cast %57 : vector<8xf32> to vector<8x1xf32>
      %cst_32 = arith.constant 3.200000e+01 : f32
      %59 = vector.broadcast %cst_32 : f32 to vector<8x1xf32>
      %60 = arith.divf %58, %59 : vector<8x1xf32>
      %61 = vector.broadcast %60 : vector<8x1xf32> to vector<8x32xf32>
      %62 = arith.subf %56, %61 : vector<8x32xf32>
      %63 = arith.mulf %62, %62 : vector<8x32xf32>
      %cst_33 = arith.constant dense<0.000000e+00> : vector<8xf32>
      %64 = vector.multi_reduction <add>, %63, %cst_33 [1] : vector<8x32xf32> to vector<8xf32>
      %65 = vector.shape_cast %64 : vector<8xf32> to vector<8x1xf32>
      %cst_34 = arith.constant 3.200000e+01 : f32
      %66 = vector.broadcast %cst_34 : f32 to vector<8x1xf32>
      %67 = arith.divf %65, %66 : vector<8x1xf32>
      %68 = vector.broadcast %60 : vector<8x1xf32> to vector<8x32xf32>
      %69 = arith.subf %56, %68 : vector<8x32xf32>
      %cst_35 = arith.constant 9.99999996E-13 : f32
      %70 = vector.broadcast %cst_35 : f32 to vector<8x1xf32>
      %71 = arith.addf %67, %70 : vector<8x1xf32>
      %72 = math.rsqrt %71 : vector<8x1xf32>
      %73 = vector.broadcast %72 : vector<8x1xf32> to vector<8x32xf32>
      %74 = arith.mulf %69, %73 : vector<8x32xf32>
      %c0_36 = arith.constant 0 : index
      %c0_37 = arith.constant 0 : index
      %75 = vector.load %arg5[%c0_36, %c0_37] : memref<1x32xf32, #tpu.memory_space<vmem>>, vector<1x32xf32>
      %76 = vector.broadcast %75 : vector<1x32xf32> to vector<8x32xf32>
      %77 = arith.mulf %74, %76 : vector<8x32xf32>
      %c0_38 = arith.constant 0 : index
      %c0_39 = arith.constant 0 : index
      %78 = vector.load %arg6[%c0_38, %c0_39] : memref<1x32xf32, #tpu.memory_space<vmem>>, vector<1x32xf32>
      %79 = vector.broadcast %78 : vector<1x32xf32> to vector<8x32xf32>
      %80 = arith.addf %77, %79 : vector<8x32xf32>
      %81 = arith.truncf %80 : vector<8x32xf32> to vector<8x32xbf16>
      %c0_40 = arith.constant 0 : index
      %c0_41 = arith.constant 0 : index
      %82 = vector.load %arg10[%c0_40, %c0_41] : memref<8x32xbf16, #tpu.memory_space<vmem>>, vector<8x32xbf16>
      tpu.vector_store %arg10[%c0_40, %c0_41], %81 {strides = array<i32>} : memref<8x32xbf16, #tpu.memory_space<vmem>>, vector<8x32xbf16>,
    } else {
    }
    %c0 = arith.constant 0 : index
    %c0_1 = arith.constant 0 : index
    %3 = vector.load %arg10[%c0, %c0_1] : memref<8x32xbf16, #tpu.memory_space<vmem>>, vector<8x32xbf16>
    %c0_2 = arith.constant 0 : index
    %c0_3 = arith.constant 0 : index
    %4 = vector.load %arg7[%c0_2, %c0_3] : memref<128x32xbf16, #tpu.memory_space<vmem>>, vector<128x32xbf16>
    %cst = arith.constant dense<0.000000e+00> : vector<8x128xf32>
    %5 = tpu.matmul %3, %4, %cst {dimension_numbers = #tpu.dot_dimension_numbers<[1], [1], [0], [0], [0, 0, 1, 0], [], []>} : vector<8x32xbf16>, vector<128x32xbf16>, vector<8x128xf32> -> vector<8x128xf32>
    %c0_4 = arith.constant 0 : index
    %c0_5 = arith.constant 0 : index
    %6 = vector.load %arg8[%c0_4, %c0_5] : memref<1x128xf32, #tpu.memory_space<vmem>>, vector<1x128xf32>
    %7 = vector.broadcast %6 : vector<1x128xf32> to vector<8x128xf32>
    %8 = arith.addf %5, %7 : vector<8x128xf32>
    %c0_6 = arith.constant 0 : index
    %c0_7 = arith.constant 0 : index
    %9 = vector.load %arg9[%c0_6, %c0_7] : memref<8x128xf32, #tpu.memory_space<vmem>>, vector<8x128xf32>
    tpu.vector_store %arg9[%c0_6, %c0_7], %8 {strides = array<i32>} : memref<8x128xf32, #tpu.memory_space<vmem>>, vector<8x128xf32>,
    return
  }
  func.func @transform_0(%arg0: i32, %arg1: i32) -> (i32, i32) {
    %c0_i32 = arith.constant 0 : i32
    %c0_i32_0 = arith.constant 0 : i32
    return %arg0, %c0_i32 : i32, i32
  }
  func.func @transform_1(%arg0: i32, %arg1: i32) -> (i32, i32) {
    %c0_i32 = arith.constant 0 : i32
    %c0_i32_0 = arith.constant 0 : i32
    %c0_i32_1 = arith.constant 0 : i32
    return %c0_i32, %c0_i32_0 : i32, i32
  }
  func.func @transform_2(%arg0: i32, %arg1: i32) -> (i32, i32) {
    %c0_i32 = arith.constant 0 : i32
    %c0_i32_0 = arith.constant 0 : i32
    %c0_i32_1 = arith.constant 0 : i32
    return %c0_i32, %c0_i32_0 : i32, i32
  }
  func.func @transform_3(%arg0: i32, %arg1: i32) -> (i32, i32) {
    %c0_i32 = arith.constant 0 : i32
    %c0_i32_0 = arith.constant 0 : i32
    %c0_i32_1 = arith.constant 0 : i32
    return %c0_i32, %c0_i32_0 : i32, i32
  }
  func.func @transform_4(%arg0: i32, %arg1: i32) -> (i32, i32) {
    %c0_i32 = arith.constant 0 : i32
    %c0_i32_0 = arith.constant 0 : i32
    %c0_i32_1 = arith.constant 0 : i32
    return %c0_i32, %c0_i32_0 : i32, i32
  }
  func.func @transform_5(%arg0: i32, %arg1: i32) -> (i32, i32) {
    %c0_i32 = arith.constant 0 : i32
    %c0_i32_0 = arith.constant 0 : i32
    return %arg1, %c0_i32 : i32, i32
  }
  func.func @transform_6(%arg0: i32, %arg1: i32) -> (i32, i32) {
    %c0_i32 = arith.constant 0 : i32
    %c0_i32_0 = arith.constant 0 : i32
    return %c0_i32, %arg1 : i32, i32
  }
  func.func @transform_7(%arg0: i32, %arg1: i32) -> (i32, i32) {
    %c0_i32 = arith.constant 0 : i32
    return %arg0, %arg1 : i32, i32
  }
}

</mosaic_0001>

<bundles_post_ra>
// kernel: tpu_custom_call.1
= control target key start
LH: loop header
LB: loop body
LE: loop exit
PB: predicated region body
PF: predicated region fallthrough
CT: control target
= control target key end

     0   :  { %12 = vsyncpa [#allocation4], 0  ;;  %s1211_s0 = inlined_call_operand.vmem [shape: bf16[16,32], index: 0, kind: input, shape index: {}]   ;;  %s1212_s1 = inlined_call_operand.vmem [shape: bf16[32,32], index: 1, kind: input, shape index: {}]   ;;  %s1213_s2 = inlined_call_operand.vmem [shape: f32[1,32], index: 2, kind: input, shape index: {}]   ;;  %s1214_s3 = inlined_call_operand.vmem [shape: f32[1,32], index: 3, kind: input, shape index: {}]   ;;  %s1215_s4 = inlined_call_operand.vmem [shape: f32[1,32], index: 4, kind: input, shape index: {}]   ;;  %s1216_s5 = inlined_call_operand.vmem [shape: bf16[256,32], index: 5, kind: input, shape index: {}]   ;;  %s1217_s6 = inlined_call_operand.vmem [shape: f32[1,256], index: 6, kind: input, shape index: {}]   ;;  %s1218_s7 = inlined_call_operand.hbm [shape: f32[16,256], index: 7, kind: output, shape index: {}]  }
   0x1   :  { %14 = vsyncpa [#allocation4 + $0x1], 0  ;;  %s1008_s24 = smov 0   ;;  %s1010_s25 = smov 0  }
   0x2   :  { %s1012_s26 = smov 0   ;;  %s1014_s27 = smov 0  }
   0x3   :  { %s1016_s28 = smov 0   ;;  %s1018_s29 = smov 0  }
   0x4   :  { %s1020_s30 = smov 0   ;;  %s1022_s8 = smov 0  }
   0x5 LB: > { %1225 = sst [smem:[#allocation6_spill]] %s940_s26  ;;  %s703_s9 = sadd.s32 4294967295, %s960_s8   ;;  %s960_s8 = sphi %s1022_s8, %s20_s8   ;;  %s956_s30 = sphi %s1020_s30, %s1239_s30   ;;  %s952_s29 = sphi %s1018_s29, %s1238_s29   ;;  %s948_s28 = sphi %s1016_s28, %s1237_s28   ;;  %s944_s27 = sphi %s1014_s27, %s1236_s27   ;;  %s940_s26 = sphi %s1012_s26, %s1235_s26   ;;  %s936_s25 = sphi %s1010_s25, %s1241_s25   ;;  %s932_s24 = sphi %s1008_s24, %s1240_s24  }
   0x6   : > { %1226 = sst [smem:[#allocation7_spill]] %s952_s29  ;;  %s704_s10 = sadd.s32 4294967294, %s960_s8  }
   0x7   : > { %1227 = sst [smem:[#allocation8_spill]] %s956_s30  ;;  %s29_s11 = sadd.s32 1, %s952_s29 }
   0x8   : > { %p30_p0 = scmp.ge.s32.totalorder %s29_s11, 2  ;;  %s32_s12 = sadd.s32 1, %s956_s30 }
   0x9   : > { %p213_p1 = scmp.ne.s32.totalorder %s940_s26, %s936_s25  ;;  %p214_p2 = scmp.eq.s32.totalorder %s703_s9, 3 }
   0xa   : > { %s1243_s11 = smov (%p30_p0, %s29_s11), 0  ;;  %s1245_s12 = smov (!%p30_p0, %s32_s12), %s956_s30 }
   0xb   : > { %1228 = sst [smem:[#allocation9_spill]] %s1243_s11  ;;  %s199_s13 = ssub.s32 %s952_s29, %s1243_s11 }
   0xc   : > { %p1059_p3 = por %p214_p2, %p213_p1  ;;  %p34_p4 = scmp.ge.s32.totalorder %s1245_s12, 2 }
   0xd   : > { %p219_p5 = scmp.ne.s32.totalorder %s936_s25, %s932_s24  ;;  %p220_p6 = scmp.eq.s32.totalorder %s704_s10, 3 }
   0xe   : > { %p707_p7 = scmp.ge.s32.totalorder %s960_s8, 1  ;;  %s1247_s12 = smov (%p34_p4, %s1245_s12), 0 }
   0xf   : > { %1230 = sst [smem:[#allocation10_spill]] %s1247_s12  ;;  %p1068_p8 = por %p220_p6, %p219_p5 }
  0x10   : > { %p272_p9 = scmp.lt.s32.totalorder %s960_s8, 5  ;;  %s198_s16 = ssub.s32 %s956_s30, %s1247_s12 }
  0x11   : > { %s203_s17 = sadd.s32 1, %s940_s26  ;;  %s200_s18 = sor.u32 %s199_s13, %s198_s16 }
  0x12   : > { %p273_p10 = pnand %p707_p7, %p272_p9  ;;  %p201_p11 = scmp.eq.s32.totalorder %s200_s18, 0 }
  0x13   : > { %s1222_s20 = sand.u32 (!%p273_p10), 1, %s936_s25   ;;  %p311_p12 = scmp.lt.s32.totalorder (!%p273_p10), %s948_s28, 1 }
  0x14   : > { %s1077_s19 = scalar_select %p201_p11, %s940_s26, %s203_s17  }
  0x15   : > { %276 = sbr.rel (%p273_p10) target bundleno = 918 (0x396), region = 48  ;;  %s1083_s21 = sshll.u32 (!%p273_p10), %s1222_s20, 3 }
  0x16   : > { %1232 = sst [smem:[#allocation11_spill]] %s1077_s19  ;;  %s710_s22 = sshll.u32 (!%p273_p10), %s944_s27, 4 }
  0x17   : > { %p316_p13 = scmp.lt.s32.totalorder (!%p273_p10), %s710_s22, 31  ;;  %p321_p0 = scmp.lt.s32.totalorder (!%p273_p10), %s944_s27, 1 }
  0x18   : > { %s310_s26 = scalar_lea.vmem (!%p273_p10), [#allocation3], %s1083_s21  ;;  %p712_p1 = scmp.ne.s32.totalorder (!%p273_p10), %s944_s27, 0 }
  0x1c   : > { %s312_s23 = scalar_select %p311_p12, %s948_s28, 1 }
  0x1d   : > { %s1249_s22 = smov (!%p316_p13, %s710_s22), 31  ;;  %328 = sbr.rel (%p712_p1) target bundleno = 625 (0x271), region = 52 }
  0x1e   : > { %s709_s9 = sshll.u32 %s312_s23, 2  ;;  %s711_s17 = sshll.u32 %s1249_s22, 2  ;;  %v850_v0 = vld [vmem:[%s1212_s1] sm:$0xff] (!%p712_p1)   ;;  %v962_v1 = vmov (!%p712_p1), 0.0   ;;  %vm351_vm0 = vcmask (!%p712_p1), 261120   ;;  %vm963_vm1 = vmmov (!%p712_p1), 0  }
  0x1f   : > { %s314_s16 = scalar_lea.vmem %s1211_s0, %s709_s9  ;;  %s1094_s11 = scalar_lea.vmem %s1216_s5, %s711_s17  ;;  %746 = vmatprep.subr.bf16.mxu0 (!%p712_p1), %v962_v1  ;;  %v356_v2 = vsel (!%p712_p1), %vm351_vm0, %v850_v0, 0  ;;  %750 = vmatprep.mubr.msk.bf16.mxu0 (!%p712_p1), %vm963_vm1, %v962_v1  ;;  %v851_v3 = vld [vmem:[%s1212_s1 + $0x8] sm:$0xff] (!%p712_p1)   ;;  %v713_v6 = vld [vmem:[%s1213_s2] ss:$0 sm:$0xff] (!%p712_p1)  ;;  %v964_v32 = vmov (!%p712_p1), -1.0   ;;  %vm459_vm3 = vcmask (!%p712_p1), 257024  }
  0x20   : > { %s1097_s30 = scalar_select %p321_p0, %s944_s27, 1 }
  0x21   : > { %747 = vmatpush3.bf16.xpose.msra.mxu0 (!%p712_p1), %v356_v2  ;;  %v359_v4 = vsel (!%p712_p1), %vm351_vm0, %v851_v3, 0  ;;  %v329_v5 = vld [vmem:[%s314_s16] sm:$0xf] (!%p712_p1) }
  0x22   : > { %s323_s19 = scalar_lea.vmem %s1217_s6, %s1097_s30  ;;  %748 = vmatprep.subr.bf16.mxu0 (!%p712_p1), %v962_v1  ;;  %v717_v48 = vld [vmem:[%s1214_s3] ss:$0 sm:$0xff] (!%p712_p1) }
  0x23   : > { %v718_v50 = vld [vmem:[%s1215_s4] ss:$0 sm:$0xff] (!%p712_p1) }
  0x29   : > { %749 = vmatpush3.bf16.xpose.msra.mxu0 %v359_v4 }
  0x30   : > { %751 = vmatmul.mubr.msk.bf16.vlgmr.msra.gmra.mrb[0].mxu0 %vm351_vm0, %v329_v5 }
 0x103   : > { %v395_v7 = vpop.f32.mrb[0].mxu0 }
 0x104   : > { %v396_v8 = vadd.f32 %v713_v6, %v395_v7  ;;  %v752_v9 = vpop.f32.mrb[1].mxu0 }
 0x105   : > { %v398_v10 = vpop.f32.mrb[2].mxu0 }
 0x106   : > { %v402_v11 = vmul.f32 0.70710677, %v396_v8  ;;  %v753_v12 = vpop.f32.mrb[3].mxu0  ;;  %v401_v35 = vmul.f32 0.5, %v396_v8 }
 0x108   : > { %v405_v13 = vand.u32 2147483647, %v402_v11  ;;  %vm403_vm2 = vcmp.ge.f32.partialorder %v402_v11, 0.0 }
 0x109   : > { %v404_v33 = vsel %vm403_vm2, 1.0, %v964_v32 }
 0x10a   : > { %v406_v14 = vmul.f32 0.3275911, %v405_v13  ;;  %v419_v16 = vsub.f32 0.0, %v405_v13 }
 0x10c   : > { %v407_v15 = vadd.f32 1.0, %v406_v14  ;;  %v420_v18 = vmul.f32 %v419_v16, %v405_v13 }
 0x10e   : > { %852 = vrcp.f32 %v407_v15  ;;  %v421_v21 = vmul.f32 1.442695, %v420_v18 }
 0x110   : > { %854 = vpow2.f32 %v421_v21 }
 0x118   : > { %v853_v17 = vpop.eup %852 }
 0x119   : > { %v410_v19 = vmul.f32 1.0614054, %v853_v17 }
 0x11a   : > { %v855_v29 = vpop.eup %854 }
 0x11b   : > { %v411_v20 = vadd.f32 -1.4531521, %v410_v19 }
 0x11d   : > { %v412_v22 = vmul.f32 %v853_v17, %v411_v20 }
 0x11f   : > { %v413_v23 = vadd.f32 1.4214138, %v412_v22 }
 0x121   : > { %v414_v24 = vmul.f32 %v853_v17, %v413_v23 }
 0x123   : > { %v415_v25 = vadd.f32 -0.28449672, %v414_v24 }
 0x125   : > { %v416_v26 = vmul.f32 %v853_v17, %v415_v25 }
 0x127   : > { %v417_v27 = vadd.f32 0.2548296, %v416_v26 }
 0x129   : > { %v418_v28 = vmul.f32 %v853_v17, %v417_v27 }
 0x12b   : > { %v423_v30 = vmul.f32 %v855_v29, %v418_v28 }
 0x12d   : > { %v424_v31 = vsub.f32 1.0, %v423_v30 }
 0x12f   : > { %v425_v34 = vmul.f32 %v424_v31, %v404_v33 }
 0x131   : > { %v426_v36 = vadd.f32 1.0, %v425_v34 }
 0x133   : > { %v427_v37 = vmul.f32 %v426_v36, %v401_v35 }
 0x135   : > { %v428_v38 = vsel %vm351_vm0, %v427_v37, 0.0 }
 0x136   : > { %429 = vadd.xlane.f32.xlu0 %v428_v38 }
 0x1c3   : > { %v430_v39 = vpop.xlane.xlu0 %429 }
 0x1c4   : > { %v432_v40 = vmul.f32 0.03125, %v430_v39 }
 0x1c6   : > { %v433_v41 = vsub.f32 %v427_v37, %v432_v40 }
 0x1c8   : > { %v434_v42 = vmul.f32 %v433_v41, %v433_v41 }
 0x1ca   : > { %v435_v43 = vsel %vm351_vm0, %v434_v42, 0.0 }
 0x1cb   : > { %436 = vadd.xlane.f32.xlu0 %v435_v43 }
 0x258   : > { %v437_v44 = vpop.xlane.xlu0 %436 }
 0x259   : > { %v438_v45 = vmul.f32 0.03125, %v437_v44 }
 0x25b   : > { %v439_v46 = vadd.f32 1e-12, %v438_v45 }
 0x25d   : > { %856 = vrsqrt.f32 %v439_v46 }
 0x267   : > { %v857_v47 = vpop.eup %856 }
 0x268   : > { %v441_v49 = vmul.f32 %v857_v47, %v433_v41 }
 0x26a   : > { %v449_v51 = vmul.f32 %v717_v48, %v441_v49 }
 0x26c   : > { %v457_v52 = vadd.f32 %v718_v50, %v449_v51 }
 0x26e   : > { %v458_v53 = vpack.c.bf16 %v457_v52, %v457_v52 }
 0x270   : > { %460 = vst.msk [vmem:[#allocation2] sm:$0xf] %vm459_vm3, %v458_v53 }
 0x271 PF: > { %v858_v54 = vld [vmem:[%s1094_s11] sm:$0xff]   ;;  %v965_v55 = vmov 0.0   ;;  %vm525_vm4 = vcmask 261120   ;;  %v859_v57 = vld [vmem:[%s1094_s11 + $0x8] sm:$0xff]   ;;  %vm966_vm5 = vmmov 0   ;;  %v860_v59 = vld [vmem:[%s1094_s11 + $0x10] sm:$0xff]  }
 0x272   : > { %754 = vmatprep.subr.bf16.mxu0 %v965_v55  ;;  %v530_v56 = vsel %vm525_vm4, %v858_v54, 0  ;;  %v533_v58 = vsel %vm525_vm4, %v859_v57, 0  ;;  %770 = vmatprep.mubr.msk.bf16.mxu0 %vm966_vm5, %v965_v55  ;;  %v536_v60 = vsel %vm525_vm4, %v860_v59, 0  ;;  %v861_v61 = vld [vmem:[%s1094_s11 + $0x18] sm:$0xff]   ;;  %v862_v63 = vld [vmem:[%s1094_s11 + $0x20] sm:$0xff]   ;;  %v863_v1 = vld [vmem:[%s1094_s11 + $0x28] sm:$0xff]  }
 0x273   : > { %755 = vmatpush3.bf16.xpose.msra.mxu0 %v530_v56  ;;  %v539_v62 = vsel %vm525_vm4, %v861_v61, 0  ;;  %v542_v0 = vsel %vm525_vm4, %v862_v63, 0  ;;  %v545_v2 = vsel %vm525_vm4, %v863_v1, 0  ;;  %v864_v3 = vld [vmem:[%s1094_s11 + $0x30] sm:$0xff]   ;;  %v865_v5 = vld [vmem:[%s1094_s11 + $0x38] sm:$0xff]   ;;  %s730_s18 = sshll.u32 %s948_s28, 1 }
 0x274   : > { %756 = vmatprep.subr.bf16.mxu0 %v965_v55  ;;  %v548_v4 = vsel %vm525_vm4, %v864_v3, 0  ;;  %v551_v6 = vsel %vm525_vm4, %v865_v5, 0  ;;  %s606_s23 = sadd.s32 %s944_s27, %s730_s18  ;;  %v719_v8 = vld [vmem:[%s323_s19] ss:$0 sm:$0xff]  ;;  %s610_s20 = sshll.u32 %s310_s26, 4  ;;  %s1156_s20 = int_to_ptr.vmem [resolvable:$true] %s610_s20 }
 0x275   : > { %s731_s29 = sshll.u32 %s606_s23, 7  ;;  %s1233_s27 = sand.u32 1, %s936_s25  }
 0x276   : > { %s1154_s9 = scalar_lea.hbm %s1218_s7, %s731_s29  ;;  %s595_s28 = scalar_lea.sflag [#allocation4], %s1233_s27 }
 0x277   : > { %v461_v7 = vld [vmem:[#allocation2] sm:$0xf]  ;;  %s866_s30 = scalar_lea.vmem %s1156_s20, 128  ;;  %s967_s19 = smov [#allocation3]  }
 0x278   : > { %p867_p2 = scmp.ne.s32.totalorder %s1156_s20, %s866_s30  ;;  %s870_s13 = sshll.u32 %s967_s19, 4  ;;  %s871_s13 = int_to_ptr.vmem [resolvable:$false] %s870_s13 }
 0x279   : > { %s872_s16 = scalar_lea.vmem %s871_s13, 256  ;;  %p873_p6 = scmp.lt.s32.totalorder %s1156_s20, %s871_s13 }
 0x27a   : > { %p868_p4 = pnand %p867_p2, %p1059_p3  ;;  %p874_p7 = scmp.lt.s32.totalorder %s872_s16, %s866_s30 }
 0x27b   : > { %757 = vmatpush3.bf16.xpose.msra.mxu0 %v533_v58 }
 0x27c   : > { %758 = vmatprep.subr.bf16.mxu0 %v965_v55  ;;  %p869_p5 = pneg %p868_p4  ;;  %p875_p9 = por %p874_p7, %p873_p6 }
 0x27e   : > { %p876_p10 = pnand %p875_p9, %p869_p5 }
 0x283   : > { %759 = vmatpush3.bf16.xpose.msra.mxu0 %v536_v60 }
 0x284   : > { %760 = vmatprep.subr.bf16.mxu0 %v965_v55 }
 0x28b   : > { %761 = vmatpush3.bf16.xpose.msra.mxu0 %v539_v62 }
 0x28c   : > { %762 = vmatprep.subr.bf16.mxu0 %v965_v55 }
 0x293   : > { %763 = vmatpush3.bf16.xpose.msra.mxu0 %v542_v0 }
 0x294   : > { %764 = vmatprep.subr.bf16.mxu0 %v965_v55 }
 0x29b   : > { %765 = vmatpush3.bf16.xpose.msra.mxu0 %v545_v2 }
 0x29c   : > { %766 = vmatprep.subr.bf16.mxu0 %v965_v55 }
 0x2a3   : > { %767 = vmatpush3.bf16.xpose.msra.mxu0 %v548_v4 }
 0x2a4   : > { %768 = vmatprep.subr.bf16.mxu0 %v965_v55 }
 0x2ab   : > { %769 = vmatpush3.bf16.xpose.msra.mxu0 %v551_v6 }
 0x2b2   : > { %771 = vmatmul.mubr.msk.bf16.vlgmr.msra.gmra.mrb[0].mxu0 %vm525_vm4, %v461_v7 }
 0x385   : > { %v587_v9 = vpop.f32.mrb[0].mxu0 }
 0x386   : > { %v588_v10 = vadd.f32 %v719_v8, %v587_v9  ;;  %v772_v11 = vpop.f32.mrb[1].mxu0 }
 0x387   : > { %v590_v12 = vpop.f32.mrb[2].mxu0 }
 0x388   : > { %593 = vst [vmem:[%s310_s26] sm:$0xff] %v588_v10  ;;  %v773_v13 = vpop.f32.mrb[3].mxu0 }
 0x389   : > { %879 = shalt.err (!%p876_p10)
}
 0x38a   : > { %s880_s26 = scalar_lea.hbm %s1154_s9, 128  ;;  %s884_s18 = scalar_lea.hbm %s1218_s7, 512 }
 0x38b   : > { %p881_p11 = scmp.ne.s32.totalorder %s1154_s9, %s880_s26  ;;  %p885_p0 = scmp.lt.u32.totalorder %s1154_s9, %s1218_s7 }
 0x38c   : > { %p886_p1 = scmp.lt.u32.totalorder %s884_s18, %s880_s26  ;;  %p888_p4 = scmp.lt.u32.totalorder %s880_s26, %s1154_s9 }
 0x38d   : > { %p882_p12 = pnand %p881_p11, %p1059_p3 }
 0x38e   : > { %p887_p2 = por %p886_p1, %p885_p0 }
 0x38f   : > { %p883_p13 = pneg %p882_p12 }
 0x390   : > { %p889_p5 = por %p888_p4, %p887_p2 }
 0x392   : > { %p890_p6 = pnand %p889_p5, %p883_p13 }
 0x394   : > { %893 = shalt.err (!%p890_p6)
}
 0x395   : > { %774 = dma.vmem_to_hbm [thread:$0]  (%p1059_p3), %s1156_s20, 128, %s1154_s9, %s595_s28  }
 0x396 PF: > { %p780_p7 = scmp.ge.s32.totalorder %s960_s8, 2  ;;  %s622_s12 = sand.u32 1, %s932_s24  }
 0x397   : > { %s623_s29 = scalar_lea.sflag [#allocation4], %s622_s12 }
 0x398   : > { %p777_p9 = pnand %p780_p7, %p1068_p8 }
 0x39a   : > { %927 = dma.done.wait (!%p777_p9), %s623_s29, 128  }
 0x39b   : > { %929 = vsyncadd (!%p777_p9), %s623_s29, 4294967168  ;;  %s20_s8 = sadd.s32 1, %s960_s8   ;;  %s1234_s11 = sld [smem:[#allocation6_spill]] }
 0x39c   : > { %p17_p10 = scmp.ge.s32.totalorder %s20_s8, 6   ;;  %s1235_s26 = sld [smem:[#allocation11_spill]] }
 0x39d   : > { %s1236_s27 = sld [smem:[#allocation7_spill]]  ;;  %s1237_s28 = sld [smem:[#allocation8_spill]] }
 0x39e   : > { %s1238_s29 = sld [smem:[#allocation9_spill]]  ;;  %s1239_s30 = sld [smem:[#allocation10_spill]] }
 0x39f   : > { %s1240_s24 = smov %s936_s25  ;;  %19 = sbr.rel (!%p17_p10) target bundleno = 5 (0x5), region = 93 }
 0x3a1   : > { %s1241_s25 = smov %s1234_s11 }
 0x3a6   :  { %628 = vsyncpa [#allocation4], 1 }
 0x3a7   :  { %630 = vsyncpa [#allocation4 + $0x1], 1 }

</bundles_post_ra>
